<compile_context>
chip_gen: v5e
topology: v5e:2x2
jax: 0.10.0
libtpu: 0.0.40
codegen_flags: <defaults>
</compile_context>

<pallas_src>
import functools

import jax
import jax.numpy as jnp
from jax.experimental import pallas as pl
from jax.experimental.pallas import tpu as pltpu


def _dwconv_kernel(x_ref, halo_ref, w_ref, b_ref, o_ref, *, TH, C, RC):
    """One (batch, row-tile) step of the depthwise 3x3 conv (stride 1, pad 1).

    x_ref    : (1, TH, WC)    input row tile, lane axis = W*C
    halo_ref : (1, 1, 2, WC)  [row above tile, row below tile]; already zero
                              where the halo falls outside the image
    w_ref    : (9, WC)        f32 taps, row k = 3*ky + kx, tiled across W
    b_ref    : (1, WC)        f32 bias, tiled across W
    o_ref    : (1, TH, WC)    output tile
    """
    WC = o_ref.shape[2]
    w = w_ref[...]            # (9, WC) f32, loaded once
    bias = b_ref[...]         # (1, WC) f32

    def shift_from_left(s):
        # out[:, j] = s[:, j - C]  (source pixel w-1); zero where w == 0.
        z = jnp.zeros((s.shape[0], C), s.dtype)
        return jnp.concatenate([z, s[:, :WC - C]], axis=1)

    def shift_from_right(s):
        # out[:, j] = s[:, j + C]  (source pixel w+1); zero where w == W-1.
        z = jnp.zeros((s.shape[0], C), s.dtype)
        return jnp.concatenate([s[:, C:], z], axis=1)

    # Process RC output rows at a time to bound the vreg live range.
    r = 0
    while r < TH:
        rc = min(RC, TH - r)
        acc = jnp.zeros((rc, WC), jnp.float32)
        for ky in range(3):
            lo = r + ky - 1          # first source row (image coords within tile)
            hi = lo + rc
            if lo < 0:
                # Needs the row above the tile (or zeros at the image top).
                slab = jnp.concatenate(
                    [halo_ref[0, 0, 0:1, :], x_ref[0, 0:hi, :]], axis=0)
            elif hi > TH:
                # Needs the row below the tile (or zeros at the image bottom).
                slab = jnp.concatenate(
                    [x_ref[0, lo:TH, :], halo_ref[0, 0, 1:2, :]], axis=0)
            else:
                slab = x_ref[0, lo:hi, :]
            slab = slab.astype(jnp.float32)                     # (rc, WC)
            acc = acc + shift_from_left(slab) * w[3 * ky + 0:3 * ky + 1, :]
            acc = acc + slab * w[3 * ky + 1:3 * ky + 2, :]
            acc = acc + shift_from_right(slab) * w[3 * ky + 2:3 * ky + 3, :]
        o_ref[0, r:r + rc, :] = (acc + bias).astype(o_ref.dtype)
        r += rc


def _pick_row_block(H, WC, itemsize, vmem_budget_bytes=16 * 1024 * 1024):
    """Largest TH (multiple of the min sublane tile, divisor of H) within budget."""
    min_rows = 8 if itemsize >= 4 else (16 if itemsize == 2 else 32)
    # Per-row VMEM: double-buffered input block + double-buffered output block.
    per_row = WC * itemsize * 4 + WC * 4
    max_rows = max(min_rows, int(vmem_budget_bytes // max(per_row, 1)))
    best = None
    t = min_rows
    while t <= min(H, max_rows):
        if H % t == 0:
            best = t
        t += min_rows
    return best if best is not None else H


def dwconv_pallas(x, H, W, weight, bias, *, row_block=None):
    """Depthwise 3x3 conv, stride 1, pad 1, groups=C, with bias.

    x: (B, N, C) with N == H*W; weight: (C, 3, 3); bias: (C,).  Returns (B, N, C).
    """
    B, N, C = x.shape
    assert N == H * W, "N must equal H*W"
    WC = W * C
    itemsize = jnp.dtype(x.dtype).itemsize
    min_rows = 8 if itemsize >= 4 else (16 if itemsize == 2 else 32)

    TH = row_block if row_block is not None else _pick_row_block(H, WC, itemsize)
    assert H % TH == 0, "row_block must divide H"
    assert TH % min_rows == 0 or TH == H, "row_block must match the sublane tile"
    n_tiles = H // TH

    # Free reshape: lane axis = W*C (lane dense whenever W*C % 128 == 0).
    x3d = x.reshape(B, H, WC)

    # Halo rows per tile (row above / row below), zero outside the image.
    # Built with tiny strided slices: ~2/TH of the input, not a full jnp.pad.
    zero_row = jnp.zeros((B, 1, WC), x.dtype)
    if n_tiles > 1:
        top = jnp.concatenate([zero_row, x3d[:, TH - 1:H - 1:TH, :]], axis=1)
        bot = jnp.concatenate([x3d[:, TH:H:TH, :], zero_row], axis=1)
    else:
        top, bot = zero_row, zero_row
    halo = jnp.stack([top, bot], axis=2)                       # (B, n_tiles, 2, WC)

    # (9, W*C) tap table: row k = 3*ky + kx, lane w*C + c holds weight[c, ky, kx].
    w_taps = jnp.transpose(weight.reshape(C, 9).astype(jnp.float32), (1, 0))  # (9, C)
    w_flat = jnp.tile(w_taps, (1, W))                                          # (9, WC)
    b_flat = jnp.tile(bias.astype(jnp.float32), W).reshape(1, WC)

    RC = min(8, TH)
    kernel = functools.partial(_dwconv_kernel, TH=TH, C=C, RC=RC)

    vmem_est = (4 * TH * WC * itemsize          # double-buffered in + out blocks
                + 4 * 2 * WC * itemsize         # halo blocks
                + 10 * WC * 4)                  # weight + bias tables
    vmem_limit = int(min(64 * 1024 * 1024, max(32 * 1024 * 1024, 2 * vmem_est)))

    cost = pl.CostEstimate(
        flops=18 * B * H * W * C,               # 9 taps * (mul + add) per output
        transcendentals=0,
        bytes_accessed=int(2 * x.size * itemsize            # input + output
                           + B * n_tiles * 2 * WC * itemsize  # halo rows
                           + 10 * WC * 4))

    out = pl.pallas_call(
        kernel,
        out_shape=jax.ShapeDtypeStruct((B, H, WC), x.dtype),
        grid=(B, n_tiles),
        in_specs=[
            pl.BlockSpec((1, TH, WC), lambda b, i: (b, i, 0)),
            pl.BlockSpec((1, 1, 2, WC), lambda b, i: (b, i, 0, 0)),
            pl.BlockSpec((9, WC), lambda b, i: (0, 0)),
            pl.BlockSpec((1, WC), lambda b, i: (0, 0)),
        ],
        out_specs=pl.BlockSpec((1, TH, WC), lambda b, i: (b, i, 0)),
        compiler_params=pltpu.CompilerParams(
            dimension_semantics=("parallel", "parallel"),
            vmem_limit_bytes=vmem_limit,
        ),
        cost_estimate=cost,
    )(x3d, halo, w_flat, b_flat)

    return out.reshape(B, N, C)


def dwconv_reference(x, H, W, weight, bias):
    """Pure-JAX reference: depthwise 3x3, pad=1, cross-correlation, per-channel bias."""
    B, N, C = x.shape
    x_nhwc = x.reshape(B, H, W, C)
    x_pad = jnp.pad(x_nhwc, ((0, 0), (1, 1), (1, 1), (0, 0)))
    acc = jnp.zeros((B, H, W, C), dtype=jnp.float32)
    for ky in range(3):
        for kx in range(3):
            acc = acc + x_pad[:, ky:ky + H, kx:kx + W, :].astype(jnp.float32) \
                  * weight[:, ky, kx].reshape(1, 1, 1, C)
    acc = acc + bias.reshape(1, 1, 1, C)
    return acc.reshape(B, N, C).astype(x.dtype)


if __name__ == "__main__":
    # Small shapes consistent with the module's forward: B=2, H=W=16, C(dim)=32.
    B, H, W, C = 2, 16, 16, 32
    N = H * W

    key = jax.random.PRNGKey(0)
    k_x, k_w, k_b = jax.random.split(key, 3)

    x = jax.random.normal(k_x, (B, N, C), dtype=jnp.float32)
    # nn.Conv2d(dim, dim, 3, groups=dim) weight is (dim, 1, 3, 3); drop the
    # singleton in-channel axis -> (C, 3, 3).  Deterministic synthetic init.
    weight = jax.random.normal(k_w, (C, 3, 3), dtype=jnp.float32) * 0.1
    bias = jax.random.normal(k_b, (C,), dtype=jnp.float32) * 0.1

    y_ref = dwconv_reference(x, H, W, weight, bias)

    # Tiled path: row_block=8 -> grid (B, 2): exercises the halo handling.
    y_tiled = jax.block_until_ready(dwconv_pallas(x, H, W, weight, bias, row_block=8))
    assert y_tiled.shape == (B, N, C)
    assert jnp.allclose(y_tiled, y_ref, atol=1e-5, rtol=1e-5), "tiled mismatch vs reference"

    # Auto row-block path (single tile per image at this size).
    y_auto = jax.block_until_ready(dwconv_pallas(x, H, W, weight, bias))
    assert jnp.allclose(y_auto, y_ref, atol=1e-5, rtol=1e-5), "auto mismatch vs reference"

    print("KERNEL_OK")
</pallas_src>

<mosaic_0001>
module attributes {stable_mosaic.version = 11 : i64} {
  func.func @_dwconv_kernel(%arg0: i32, %arg1: i32, %arg2: memref<1x8x512xf32, #tpu.memory_space<vmem>>, %arg3: memref<1x1x2x512xf32, #tpu.memory_space<vmem>>, %arg4: memref<9x512xf32, #tpu.memory_space<vmem>>, %arg5: memref<1x512xf32, #tpu.memory_space<vmem>>, %arg6: memref<1x8x512xf32, #tpu.memory_space<vmem>>) attributes {dimension_semantics = [#tpu.dimension_semantics<parallel>, #tpu.dimension_semantics<parallel>], iteration_bounds = array<i64: 2, 2>, scalar_prefetch = 0 : i64, scratch_operands = 0 : i64, tpu.core_type = #tpu.core_type<tc>, window_params = [{transform_indices = @transform_0, window_bounds = array<i64: 1, 8, 512>}, {transform_indices = @transform_1, window_bounds = array<i64: 1, 1, 2, 512>}, {pipeline_mode = #tpu.pipeline_mode<synchronous>, transform_indices = @transform_2, window_bounds = array<i64: 9, 512>}, {pipeline_mode = #tpu.pipeline_mode<synchronous>, transform_indices = @transform_3, window_bounds = array<i64: 1, 512>}, {transform_indices = @transform_4, window_bounds = array<i64: 1, 8, 512>}]} {
    %c0 = arith.constant 0 : index
    %c0_0 = arith.constant 0 : index
    %0 = vector.load %arg4[%c0, %c0_0] : memref<9x512xf32, #tpu.memory_space<vmem>>, vector<9x512xf32>
    %c0_1 = arith.constant 0 : index
    %c0_2 = arith.constant 0 : index
    %1 = vector.load %arg5[%c0_1, %c0_2] : memref<1x512xf32, #tpu.memory_space<vmem>>, vector<1x512xf32>
    %cst = arith.constant 0.000000e+00 : f32
    %2 = vector.broadcast %cst : f32 to vector<8x512xf32>
    %c0_3 = arith.constant 0 : index
    %c0_4 = arith.constant 0 : index
    %c0_5 = arith.constant 0 : index
    %c0_6 = arith.constant 0 : index
    %3 = vector.load %arg3[%c0_3, %c0_4, %c0_5, %c0_6] : memref<1x1x2x512xf32, #tpu.memory_space<vmem>>, vector<1x1x1x512xf32>
    %4 = vector.shape_cast %3 : vector<1x1x1x512xf32> to vector<1x512xf32>
    %c0_7 = arith.constant 0 : index
    %c0_8 = arith.constant 0 : index
    %c0_9 = arith.constant 0 : index
    %5 = vector.load %arg2[%c0_7, %c0_8, %c0_9] : memref<1x8x512xf32, #tpu.memory_space<vmem>>, vector<1x7x512xf32>
    %6 = vector.shape_cast %5 : vector<1x7x512xf32> to vector<7x512xf32>
    %7 = tpu.concatenate %4, %6 in 0 : vector<1x512xf32>, vector<7x512xf32> -> vector<8x512xf32>
    %cst_10 = arith.constant 0.000000e+00 : f32
    %8 = vector.broadcast %cst_10 : f32 to vector<8x32xf32>
    %9 = vector.extract_strided_slice %7 {offsets = [0, 0], sizes = [8, 480], strides = [1, 1]} : vector<8x512xf32> to vector<8x480xf32>
    %10 = tpu.concatenate %8, %9 in 1 : vector<8x32xf32>, vector<8x480xf32> -> vector<8x512xf32>
    %11 = vector.extract_strided_slice %0 {offsets = [0, 0], sizes = [1, 512], strides = [1, 1]} : vector<9x512xf32> to vector<1x512xf32>
    %12 = vector.broadcast %11 : vector<1x512xf32> to vector<8x512xf32>
    %13 = arith.mulf %10, %12 : vector<8x512xf32>
    %14 = arith.addf %2, %13 : vector<8x512xf32>
    %15 = vector.extract_strided_slice %0 {offsets = [1, 0], sizes = [1, 512], strides = [1, 1]} : vector<9x512xf32> to vector<1x512xf32>
    %16 = vector.broadcast %15 : vector<1x512xf32> to vector<8x512xf32>
    %17 = arith.mulf %7, %16 : vector<8x512xf32>
    %18 = arith.addf %14, %17 : vector<8x512xf32>
    %cst_11 = arith.constant 0.000000e+00 : f32
    %19 = vector.broadcast %cst_11 : f32 to vector<8x32xf32>
    %20 = vector.extract_strided_slice %7 {offsets = [0, 32], sizes = [8, 480], strides = [1, 1]} : vector<8x512xf32> to vector<8x480xf32>
    %21 = tpu.concatenate %20, %19 in 1 : vector<8x480xf32>, vector<8x32xf32> -> vector<8x512xf32>
    %22 = vector.extract_strided_slice %0 {offsets = [2, 0], sizes = [1, 512], strides = [1, 1]} : vector<9x512xf32> to vector<1x512xf32>
    %23 = vector.broadcast %22 : vector<1x512xf32> to vector<8x512xf32>
    %24 = arith.mulf %21, %23 : vector<8x512xf32>
    %25 = arith.addf %18, %24 : vector<8x512xf32>
    %c0_12 = arith.constant 0 : index
    %c0_13 = arith.constant 0 : index
    %c0_14 = arith.constant 0 : index
    %26 = vector.load %arg2[%c0_12, %c0_13, %c0_14] : memref<1x8x512xf32, #tpu.memory_space<vmem>>, vector<1x8x512xf32>
    %27 = vector.shape_cast %26 : vector<1x8x512xf32> to vector<8x512xf32>
    %cst_15 = arith.constant 0.000000e+00 : f32
    %28 = vector.broadcast %cst_15 : f32 to vector<8x32xf32>
    %29 = vector.extract_strided_slice %27 {offsets = [0, 0], sizes = [8, 480], strides = [1, 1]} : vector<8x512xf32> to vector<8x480xf32>
    %30 = tpu.concatenate %28, %29 in 1 : vector<8x32xf32>, vector<8x480xf32> -> vector<8x512xf32>
    %31 = vector.extract_strided_slice %0 {offsets = [3, 0], sizes = [1, 512], strides = [1, 1]} : vector<9x512xf32> to vector<1x512xf32>
    %32 = vector.broadcast %31 : vector<1x512xf32> to vector<8x512xf32>
    %33 = arith.mulf %30, %32 : vector<8x512xf32>
    %34 = arith.addf %25, %33 : vector<8x512xf32>
    %35 = vector.extract_strided_slice %0 {offsets = [4, 0], sizes = [1, 512], strides = [1, 1]} : vector<9x512xf32> to vector<1x512xf32>
    %36 = vector.broadcast %35 : vector<1x512xf32> to vector<8x512xf32>
    %37 = arith.mulf %27, %36 : vector<8x512xf32>
    %38 = arith.addf %34, %37 : vector<8x512xf32>
    %cst_16 = arith.constant 0.000000e+00 : f32
    %39 = vector.broadcast %cst_16 : f32 to vector<8x32xf32>
    %40 = vector.extract_strided_slice %27 {offsets = [0, 32], sizes = [8, 480], strides = [1, 1]} : vector<8x512xf32> to vector<8x480xf32>
    %41 = tpu.concatenate %40, %39 in 1 : vector<8x480xf32>, vector<8x32xf32> -> vector<8x512xf32>
    %42 = vector.extract_strided_slice %0 {offsets = [5, 0], sizes = [1, 512], strides = [1, 1]} : vector<9x512xf32> to vector<1x512xf32>
    %43 = vector.broadcast %42 : vector<1x512xf32> to vector<8x512xf32>
    %44 = arith.mulf %41, %43 : vector<8x512xf32>
    %45 = arith.addf %38, %44 : vector<8x512xf32>
    %c0_17 = arith.constant 0 : index
    %c1 = arith.constant 1 : index
    %c0_18 = arith.constant 0 : index
    %46 = vector.load %arg2[%c0_17, %c1, %c0_18] : memref<1x8x512xf32, #tpu.memory_space<vmem>>, vector<1x7x512xf32>
    %47 = vector.shape_cast %46 : vector<1x7x512xf32> to vector<7x512xf32>
    %c0_19 = arith.constant 0 : index
    %c0_20 = arith.constant 0 : index
    %c1_21 = arith.constant 1 : index
    %c0_22 = arith.constant 0 : index
    %48 = vector.load %arg3[%c0_19, %c0_20, %c1_21, %c0_22] : memref<1x1x2x512xf32, #tpu.memory_space<vmem>>, vector<1x1x1x512xf32>
    %49 = vector.shape_cast %48 : vector<1x1x1x512xf32> to vector<1x512xf32>
    %50 = tpu.concatenate %47, %49 in 0 : vector<7x512xf32>, vector<1x512xf32> -> vector<8x512xf32>
    %cst_23 = arith.constant 0.000000e+00 : f32
    %51 = vector.broadcast %cst_23 : f32 to vector<8x32xf32>
    %52 = vector.extract_strided_slice %50 {offsets = [0, 0], sizes = [8, 480], strides = [1, 1]} : vector<8x512xf32> to vector<8x480xf32>
    %53 = tpu.concatenate %51, %52 in 1 : vector<8x32xf32>, vector<8x480xf32> -> vector<8x512xf32>
    %54 = vector.extract_strided_slice %0 {offsets = [6, 0], sizes = [1, 512], strides = [1, 1]} : vector<9x512xf32> to vector<1x512xf32>
    %55 = vector.broadcast %54 : vector<1x512xf32> to vector<8x512xf32>
    %56 = arith.mulf %53, %55 : vector<8x512xf32>
    %57 = arith.addf %45, %56 : vector<8x512xf32>
    %58 = vector.extract_strided_slice %0 {offsets = [7, 0], sizes = [1, 512], strides = [1, 1]} : vector<9x512xf32> to vector<1x512xf32>
    %59 = vector.broadcast %58 : vector<1x512xf32> to vector<8x512xf32>
    %60 = arith.mulf %50, %59 : vector<8x512xf32>
    %61 = arith.addf %57, %60 : vector<8x512xf32>
    %cst_24 = arith.constant 0.000000e+00 : f32
    %62 = vector.broadcast %cst_24 : f32 to vector<8x32xf32>
    %63 = vector.extract_strided_slice %50 {offsets = [0, 32], sizes = [8, 480], strides = [1, 1]} : vector<8x512xf32> to vector<8x480xf32>
    %64 = tpu.concatenate %63, %62 in 1 : vector<8x480xf32>, vector<8x32xf32> -> vector<8x512xf32>
    %65 = vector.extract_strided_slice %0 {offsets = [8, 0], sizes = [1, 512], strides = [1, 1]} : vector<9x512xf32> to vector<1x512xf32>
    %66 = vector.broadcast %65 : vector<1x512xf32> to vector<8x512xf32>
    %67 = arith.mulf %64, %66 : vector<8x512xf32>
    %68 = arith.addf %61, %67 : vector<8x512xf32>
    %69 = vector.broadcast %1 : vector<1x512xf32> to vector<8x512xf32>
    %70 = arith.addf %68, %69 : vector<8x512xf32>
    %c0_25 = arith.constant 0 : index
    %c0_26 = arith.constant 0 : index
    %c0_27 = arith.constant 0 : index
    %71 = vector.load %arg6[%c0_25, %c0_26, %c0_27] : memref<1x8x512xf32, #tpu.memory_space<vmem>>, vector<1x8x512xf32>
    %72 = vector.shape_cast %71 : vector<1x8x512xf32> to vector<8x512xf32>
    %73 = vector.shape_cast %70 : vector<8x512xf32> to vector<1x8x512xf32>
    tpu.vector_store %arg6[%c0_25, %c0_26, %c0_27], %73 {strides = array<i32>} : memref<1x8x512xf32, #tpu.memory_space<vmem>>, vector<1x8x512xf32>,
    return
  }
  func.func @transform_0(%arg0: i32, %arg1: i32) -> (i32, i32, i32) {
    %c0_i32 = arith.constant 0 : i32
    %c0_i32_0 = arith.constant 0 : i32
    return %arg0, %arg1, %c0_i32 : i32, i32, i32
  }
  func.func @transform_1(%arg0: i32, %arg1: i32) -> (i32, i32, i32, i32) {
    %c0_i32 = arith.constant 0 : i32
    %c0_i32_0 = arith.constant 0 : i32
    %c0_i32_1 = arith.constant 0 : i32
    return %arg0, %arg1, %c0_i32, %c0_i32_0 : i32, i32, i32, i32
  }
  func.func @transform_2(%arg0: i32, %arg1: i32) -> (i32, i32) {
    %c0_i32 = arith.constant 0 : i32
    %c0_i32_0 = arith.constant 0 : i32
    %c0_i32_1 = arith.constant 0 : i32
    return %c0_i32, %c0_i32_0 : i32, i32
  }
  func.func @transform_3(%arg0: i32, %arg1: i32) -> (i32, i32) {
    %c0_i32 = arith.constant 0 : i32
    %c0_i32_0 = arith.constant 0 : i32
    %c0_i32_1 = arith.constant 0 : i32
    return %c0_i32, %c0_i32_0 : i32, i32
  }
  func.func @transform_4(%arg0: i32, %arg1: i32) -> (i32, i32, i32) {
    %c0_i32 = arith.constant 0 : i32
    %c0_i32_0 = arith.constant 0 : i32
    return %arg0, %arg1, %c0_i32 : i32, i32, i32
  }
}

</mosaic_0001>

<bundles_post_ra>
// kernel: tpu_custom_call.1
= control target key start
LH: loop header
LB: loop body
LE: loop exit
PB: predicated region body
PF: predicated region fallthrough
CT: control target
= control target key end

     0   :  { %s1543_s0 = inlined_call_operand.hbm [shape: f32[2,16,512], index: 0, kind: input, shape index: {}]   ;;  %s1544_s1 = inlined_call_operand.hbm [shape: f32[2,2,2,512], index: 1, kind: input, shape index: {}]   ;;  %s1545_s2 = inlined_call_operand.hbm [shape: f32[9,512], index: 2, kind: input, shape index: {}]   ;;  %s1546_s3 = inlined_call_operand.hbm [shape: f32[1,512], index: 3, kind: input, shape index: {}]   ;;  %s1547_s4 = inlined_call_operand.hbm [shape: f32[2,16,512], index: 4, kind: output, shape index: {}]  }
   0x1   :  { %1552 = sst [smem:[#allocation20_spill]] %s1543_s0 }
   0x2   :  { %1553 = sst [smem:[#allocation21_spill]] %s1545_s2 }
   0x3   :  { %1554 = sst [smem:[#allocation22_spill]] %s1546_s3 }
   0x4   :  { %9 = vsyncpa [#allocation3], 0 }
   0x5   :  { %11 = vsyncpa [#allocation3 + $0x1], 0 }
   0x6   :  { %12 = vsyncpa [#allocation6], 0 }
   0x7   :  { %14 = vsyncpa [#allocation6 + $0x1], 0 }
   0x8   :  { %15 = vsyncpa [#allocation9], 0 }
   0x9   :  { %16 = vsyncpa [#allocation4], 0 }
   0xa   :  { %18 = vsyncpa [#allocation4 + $0x1], 0  ;;  %s1173_s15 = smov 0   ;;  %s1175_s16 = smov 0  }
   0xb   :  { %s1177_s17 = smov 0   ;;  %s1179_s18 = smov 0  }
   0xc   :  { %s1181_s19 = smov 0   ;;  %s1183_s20 = smov 0  }
   0xd   :  { %s1185_s21 = smov 0   ;;  %s1187_s22 = smov 0  }
   0xe LB: > { %1555 = sst [smem:[#allocation16_spill]] %s1132_s20  ;;  %s1214_s23 = sadd.s32 4294967295, %s1140_s22   ;;  %s1140_s22 = sphi %s1187_s22, %s24_s22   ;;  %s1136_s21 = sphi %s1185_s21, %s1571_s21   ;;  %s1132_s20 = sphi %s1183_s20, %s1570_s20   ;;  %s1128_s19 = sphi %s1181_s19, %s1569_s19   ;;  %s1124_s18 = sphi %s1179_s18, %s1568_s18   ;;  %s1120_s17 = sphi %s1177_s17, %s1574_s17   ;;  %s1116_s16 = sphi %s1175_s16, %s1573_s16   ;;  %s1112_s15 = sphi %s1173_s15, %s1572_s15  }
   0xf   : > { %1556 = sst [smem:[#allocation17_spill]] %s1136_s21  ;;  %p773_p0 = scmp.ge.s32.totalorder %s1140_s22, 1 }
  0x10   : > { %p59_p1 = scmp.eq.s32.totalorder %s1214_s23, 0  ;;  %p167_p2 = scmp.lt.s32.totalorder %s1140_s22, 5 }
  0x11   : > { %s1557_s2 = sld [smem:[#allocation21_spill]]  ;;  %s1142_s28 = smov [#allocation7]  }
  0x12   : > { %p1222_p3 = pnand %p773_p0, %p167_p2  ;;  %s180_s29 = sshll.u32 %s1142_s28, 4  ;;  %s181_s29 = int_to_ptr.vmem [resolvable:$true] %s180_s29 }
  0x13   : > { %s1559_s3 = sld [smem:[#allocation22_spill]]  ;;  %s1143_s7 = smov 512  }
  0x14   : > { %p812_p4 = pneg %p1222_p3  ;;  %s1144_s8 = smov 32  }
  0x15   : > { %s1145_s9 = smov [#allocation8]   ;;  %s772_s11 = sadd.s32 4294967294, %s1140_s22  }
  0x16   : > { %p813_p5 = pnand %p812_p4, %p59_p1  ;;  %s195_s10 = sshll.u32 %s1145_s9, 4  ;;  %s196_s10 = int_to_ptr.vmem [resolvable:$true] %s195_s10 }
  0x17   : > { %s178_s26 = sshll.u32 %s1557_s2, 4  ;;  %s33_s12 = sadd.s32 1, %s1132_s20  ;;  %s179_s26 = int_to_ptr.hbm [resolvable:$true] %s178_s26 }
  0x18   : > { %815 = dma.hbm_to_vmem [thread:$0]  (!%p813_p5), %s179_s26, 1024, %s181_s29, [#allocation6], %s1143_s7, %s1143_s7, %s1144_s8  }
  0x19   : > { %s193_s6 = sshll.u32 %s1559_s3, 4  ;;  %p34_p6 = scmp.ge.s32.totalorder %s33_s12, 2  ;;  %s194_s6 = int_to_ptr.hbm [resolvable:$true] %s193_s6 }
  0x1a   : > { %818 = dma.hbm_to_vmem [thread:$0]  (!%p813_p5), %s194_s6, 64, %s196_s10, [#allocation9]  }
  0x1b   : > { %s36_s13 = sadd.s32 1, %s1136_s21  ;;  %s45_s14 = sadd.s32 1, %s1120_s17 }
  0x1c   : > { %p52_p7 = scmp.ne.s32.totalorder %s1120_s17, %s1116_s16  ;;  %s1576_s12 = smov (%p34_p6, %s33_s12), 0 }
  0x1d   : > { %1560 = sst [smem:[#allocation18_spill]] %s1576_s12  ;;  %s1578_s13 = smov (!%p34_p6, %s36_s13), %s1136_s21 }
  0x1e   : > { %s41_s24 = ssub.s32 %s1132_s20, %s1576_s12  ;;  %p53_p8 = scmp.eq.s32.totalorder %s1140_s22, 0 }
  0x1f   : > { %p38_p9 = scmp.ge.s32.totalorder %s1578_s13, 2  ;;  %p58_p10 = scmp.ne.s32.totalorder %s1116_s16, %s1112_s15 }
  0x20   : > { %p1247_p11 = por %p53_p8, %p52_p7  ;;  %p154_p12 = scmp.eq.s32.totalorder %s1214_s23, 3 }
  0x21   : > { %s1580_s13 = smov (%p38_p9, %s1578_s13), 0  ;;  %p1256_p13 = por %p59_p1, %p58_p10 }
  0x22   : > { %1562 = sst [smem:[#allocation19_spill]] %s1580_s13  ;;  %p1260_p0 = por %p154_p12, %p52_p7 }
  0x23   : > { %s40_s29 = ssub.s32 %s1136_s21, %s1580_s13  ;;  %p160_p2 = scmp.eq.s32.totalorder %s772_s11, 3 }
  0x24   : > { %s42_s30 = sor.u32 %s41_s24, %s40_s29  ;;  %p832_p4 = scmp.lt.s32.totalorder %s1140_s22, 4 }
  0x25   : > { %p43_p5 = scmp.eq.s32.totalorder %s42_s30, 0  ;;  %p1267_p6 = por %p160_p2, %p58_p10 }
  0x26   : > { %s206_s6 = sand.u32 1, %s1120_s17   ;;  %s778_s7 = sshll.u32 %s1132_s20, 2 }
  0x27   : > { %s1274_s8 = scalar_select %p43_p5, %s1120_s17, %s45_s14  }
  0x28   : > { %s777_s9 = sshll.u32 %s206_s6, 5  ;;  %s779_s10 = sshll.u32 %s1136_s21, 3 }
  0x29   : > { %s215_s2 = sadd.s32 %s779_s10, %s778_s7  ;;  %s210_s3 = scalar_lea.vmem [#allocation2], %s777_s9 }
  0x2a   : > { %s221_s13 = sshll.u32 %s210_s3, 4  ;;  %s780_s11 = sshll.u32 %s215_s2, 3  ;;  %s222_s13 = int_to_ptr.vmem [resolvable:$true] %s221_s13 }
  0x2b   : > { %s1566_s0 = sld [smem:[#allocation20_spill]]  ;;  %p1284_p7 = pnand %p832_p4, %p1247_p11 }
  0x2c   : > { %s784_s20 = sshll.u32 %s215_s2, 1  ;;  %s207_s7 = scalar_lea.sflag [#allocation3], %s206_s6 }
  0x2d   : > { %s228_s3 = sand.u32 1, %s1140_s22   ;;  %s781_s9 = sshll.u32 %s206_s6, 3 }
  0x2e   : > { %s239_s12 = scalar_lea.hbm %s1544_s1, %s784_s20  ;;  %s232_s25 = scalar_lea.vmem [#allocation5], %s781_s9 }
  0x2f   : > { %s241_s24 = sshll.u32 %s239_s12, 4  ;;  %s1299_s2 = sand.u32 (!%p1222_p3), 1, %s1116_s16   ;;  %s242_s24 = int_to_ptr.hbm [resolvable:$true] %s241_s24 }
  0x30   : > { %252 = sbr.rel (%p1222_p3) target bundleno = 250 (0xfa), region = 36  ;;  %s786_s21 = sshll.u32 (!%p1222_p3), %s1299_s2, 5 }
  0x31   : > { %s217_s29 = scalar_lea.hbm %s1566_s0, %s780_s11  ;;  %s243_s11 = sshll.u32 %s232_s25, 4  ;;  %s244_s11 = int_to_ptr.vmem [resolvable:$true] %s243_s11 }
  0x32   : > { %s219_s14 = sshll.u32 %s217_s29, 4  ;;  %s229_s0 = scalar_lea.sflag [#allocation6], %s228_s3  ;;  %s220_s14 = int_to_ptr.hbm [resolvable:$true] %s219_s14 }
  0x33   : > { %822 = dma.hbm_to_vmem [thread:$0]  (!%p1284_p7), %s220_s14, 512, %s222_s13, %s207_s7  }
  0x34   : > { %825 = dma.hbm_to_vmem [thread:$0]  (!%p1284_p7), %s242_s24, 128, %s244_s11, %s229_s0  }
  0x35   : > { %s255_s20 = scalar_lea.sflag [#allocation3], %s1299_s2  ;;  %s1305_s13 = scalar_lea.vmem [#allocation2], %s786_s21 }
  0x36   : > { %1091 = dma.done.wait (%p1256_p13), %s255_s20, 512  }
  0x37   : > { %1093 = vsyncadd (%p1256_p13), %s255_s20, 4294966784  ;;  %s264_s0 = sand.u32 1, %s1214_s23   ;;  %s787_s27 = sshll.u32 %s1299_s2, 3 }
  0x38   : > { %s265_s6 = scalar_lea.sflag [#allocation6], %s264_s0  ;;  %s1313_s29 = scalar_lea.vmem [#allocation5], %s787_s27 }
  0x39   : > { %1095 = dma.done.wait (%p1256_p13), %s265_s6, 128  }
  0x3a   : > { %1097 = vsyncadd (%p1256_p13), %s265_s6, 4294967168 }
  0x3b   : > { %1099 = dma.done.wait (%p59_p1), [#allocation6], 1024  }
  0x3c   : > { %1101 = vsyncadd (%p59_p1), [#allocation6], 4294966272 }
  0x3d   : > { %1103 = dma.done.wait (%p59_p1), [#allocation9], 64  }
  0x3e   : > { %1105 = vsyncadd (%p59_p1), [#allocation9], 4294967232  ;;  %v318_v0 = vld [vmem:[%s1313_s29] ss:$2 sm:$0xf]  ;;  %vm344_vm0 = vcmask 1040384  }
  0x3f   : > { %v321_v1 = vld [vmem:[%s1305_s13 + $0x10] sm:$0x7f]  ;;  %v326_v2 = vperm.slane %v318_v0, 2  ;;  %v319_v4 = vld [vmem:[%s1305_s13] sm:$0x7f]  ;;  %v324_v5 = vperm.slane %v318_v0, 0 }
  0x40   : > { %v338_v3 = vrot.slane %v321_v1, 7  ;;  %v336_v6 = vrot.slane %v319_v4, 7  ;;  %v322_v7 = vld [vmem:[%s1305_s13 + $0x18] sm:$0x7f]  ;;  %v320_v9 = vld [vmem:[%s1305_s13 + $0x8] sm:$0x7f] }
  0x41   : > { %s1146_s23 = smov 32   ;;  %v327_v11 = vperm.slane %v318_v0, 3  ;;  %v339_v12 = vrot.slane %v322_v7, 7  ;;  %s1147_s26 = smov 96   ;;  %v325_v13 = vperm.slane %v318_v0, 1  ;;  %v337_v14 = vrot.slane %v320_v9, 7 }
  0x42   : > { %v1332_v8 = vsel %vm344_vm0, %v326_v2, %v338_v3  ;;  %v345_v10 = vsel %vm344_vm0, %v324_v5, %v336_v6  ;;  %v423_v17 = vld [vmem:[%s1305_s13] sm:$0xff]  ;;  %v1359_v18 = vld [vmem:[%s1305_s13 + $0x10] sm:$0xff]  ;;  %v1362_v19 = vld [vmem:[%s1305_s13 + $0x8] sm:$0xff]  ;;  %vm526_vm1 = vcmask 1046528   ;;  %vm402_vm2 = vcmask 785408   ;;  %s793_s30 = sshll.u32 %s1124_s18, 2 }
  0x43   : > { %357 = vrot.lane.b32.xlu1 %v1332_v8, %s1146_s23  ;;  %353 = vrot.lane.b32.xlu0 %v345_v10, %s1146_s23  ;;  %v1341_v15 = vsel %vm344_vm0, %v327_v11, %v339_v12  ;;  %v1344_v16 = vsel %vm344_vm0, %v325_v13, %v337_v14  ;;  %v1367_v20 = vld [vmem:[%s1305_s13 + $0x18] sm:$0xff]  ;;  %v499_v21 = vld [vmem:[%s1305_s13] sm:$0xfe]  ;;  %v1409_v40 = vld [vmem:[#allocation7] sm:$0xff]  ;;  %vm361_vm3 = vcmask 261120   ;;  %s794_s14 = sshll.u32 %s1128_s19, 3 }
  0x44   : > { %394 = vrot.lane.b32.xlu2 %v345_v10, %s1147_s26  ;;  %v791_v22 = vld [vmem:[%s1313_s29 + $0x1] ss:$2 sm:$0xf]  ;;  %v509_v23 = vrot.slane %v499_v21, 1  ;;  %v502_v29 = vld [vmem:[%s1305_s13 + $0x18] sm:$0xfe]  ;;  %s632_s7 = sadd.s32 %s794_s14, %s793_s30 }
  0x45   : > { %v518_v24 = vperm.slane %v791_v22, 0  ;;  %v500_v25 = vld [vmem:[%s1305_s13 + $0x8] sm:$0xfe]  ;;  %v519_v27 = vperm.slane %v791_v22, 1  ;;  %v501_v30 = vld [vmem:[%s1305_s13 + $0x10] sm:$0xfe] }
  0x46   : > { %v510_v26 = vrot.slane %v500_v25, 1  ;;  %v512_v32 = vrot.slane %v502_v29, 1  ;;  %v521_v33 = vperm.slane %v791_v22, 3  ;;  %v511_v34 = vrot.slane %v501_v30, 1  ;;  %v1422_v61 = vld [vmem:[#allocation7 + $0x10] sm:$0xff]  ;;  %v1427_v2 = vld [vmem:[#allocation7 + $0x18] sm:$0xff] }
  0x47   : > { %v1381_v28 = vsel %vm526_vm1, %v509_v23, %v518_v24  ;;  %v520_v35 = vperm.slane %v791_v22, 2  ;;  %v382_v41 = vperm.slane %v1409_v40, 1  ;;  %v370_v42 = vperm.slane %v1409_v40, 0  ;;  %v1429_v3 = vld [vmem:[#allocation7 + $0x8] sm:$0xff]  ;;  %s795_s18 = sshll.u32 %s632_s7, 3  ;;  %s308_s10 = scalar_lea.vmem [#allocation10], %s786_s21 }
  0x48   : > { %v1387_v31 = vsel %vm526_vm1, %v510_v26, %v519_v27  ;;  %v1393_v36 = vsel %vm526_vm1, %v512_v32, %v521_v33  ;;  %v411_v46 = vperm.slane %v1409_v40, 2  ;;  %v447_v48 = vperm.slane %v1409_v40, 3  ;;  %s634_s9 = scalar_lea.hbm %s1547_s4, %s795_s18  ;;  %s636_s12 = sshll.u32 %s308_s10, 4  ;;  %s637_s12 = int_to_ptr.vmem [resolvable:$true] %s636_s12 }
  0x49   : > { %v1395_v37 = vsel %vm526_vm1, %v511_v34, %v520_v35  ;;  %v386_v45 = vmul.f32 %v382_v41, %v345_v10  ;;  %v459_v52 = vperm.slane %v1409_v40, 4  ;;  %v384_v1 = vperm.slane %v1422_v61, 1  ;;  %s638_s25 = sshll.u32 %s634_s9, 4  ;;  %s621_s11 = scalar_lea.sflag [#allocation4], %s1299_s2  ;;  %s639_s25 = int_to_ptr.hbm [resolvable:$true] %s638_s25 }
  0x4a   : > { %v385_v4 = vperm.slane %v1427_v2, 1  ;;  %v373_v6 = vperm.slane %v1427_v2, 0  ;;  %v383_v9 = vperm.slane %v1429_v3, 1  ;;  %v371_v11 = vperm.slane %v1429_v3, 0  ;;  %s1044_s24 = sshra.s32 %s639_s25, 4  ;;  %s1050_s0 = scalar_lea.hbm %s1547_s4, 128  ;;  %s1045_s24 = int_to_ptr.hbm [resolvable:$true] %s1044_s24 }
  0x4b   : > { %359 = vrot.lane.b32.xlu1 %v1341_v15, %s1146_s23  ;;  %355 = vrot.lane.b32.xlu0 %v1344_v16, %s1146_s23  ;;  %v463_v57 = vmul.f32 %v459_v52, %v423_v17  ;;  %v388_v5 = vmul.f32 %v384_v1, %v1332_v8  ;;  %v372_v12 = vperm.slane %v1422_v61, 0  ;;  %v414_v22 = vperm.slane %v1427_v2, 2  ;;  %s1046_s20 = scalar_lea.hbm %s1045_s24, 32  ;;  %p1051_p9 = scmp.lt.s32.totalorder %s1045_s24, %s1547_s4 }
  0x4c   : > { %396 = vrot.lane.b32.xlu2 %v1344_v16, %s1147_s26  ;;  %v389_v23 = vmul.f32 %v385_v4, %v1341_v15  ;;  %v412_v25 = vperm.slane %v1429_v3, 2  ;;  %v413_v26 = vperm.slane %v1422_v61, 2  ;;  %v460_v27 = vperm.slane %v1429_v3, 4  ;;  %p1047_p1 = scmp.ne.s32.totalorder %s1045_s24, %s1046_s20  ;;  %p1052_p10 = scmp.lt.s32.totalorder %s1050_s0, %s1046_s20 }
  0x4d   : > { %v387_v33 = vmul.f32 %v383_v9, %v1344_v16  ;;  %v462_v34 = vperm.slane %v1427_v2, 4  ;;  %v450_v41 = vperm.slane %v1427_v2, 3  ;;  %v488_v9 = vperm.slane %v1429_v3, 5 }
  0x4e   : > { %p1048_p3 = pnand %p1047_p1, %p1260_p0  ;;  %p1053_p11 = por %p1052_p10, %p1051_p9 }
  0x4f   : > { %v466_v16 = vmul.f32 %v462_v34, %v1367_v20 }
  0x50   : > { %p1049_p8 = pneg %p1048_p3 }
  0x52   : > { %p1054_p12 = pnand %p1053_p11, %p1049_p8 }
  0x53   : > { %400 = vrot.lane.b32.xlu1 %v1341_v15, %s1147_s26  ;;  %398 = vrot.lane.b32.xlu0 %v1332_v8, %s1147_s26 }
  0x54   : > { %431 = vrot.lane.b32.xlu2 %v423_v17, %s1146_s23 }
  0x5b   : > { %435 = vrot.lane.b32.xlu1 %v1359_v18, %s1146_s23  ;;  %433 = vrot.lane.b32.xlu0 %v1362_v19, %s1146_s23 }
  0x5c   : > { %437 = vrot.lane.b32.xlu2 %v1367_v20, %s1146_s23 }
  0x63   : > { %473 = vrot.lane.b32.xlu1 %v1362_v19, %s1147_s26  ;;  %471 = vrot.lane.b32.xlu0 %v423_v17, %s1147_s26  ;;  %v461_v17 = vperm.slane %v1422_v61, 4 }
  0x64   : > { %475 = vrot.lane.b32.xlu2 %v1359_v18, %s1147_s26 }
  0x6b   : > { %535 = vrot.lane.b32.xlu1 %v1381_v28, %s1146_s23  ;;  %477 = vrot.lane.b32.xlu0 %v1367_v20, %s1147_s26 }
  0x6c   : > { %537 = vrot.lane.b32.xlu2 %v1387_v31, %s1146_s23 }
  0x73   : > { %541 = vrot.lane.b32.xlu1 %v1393_v36, %s1146_s23  ;;  %539 = vrot.lane.b32.xlu0 %v1395_v37, %s1146_s23 }
  0x74   : > { %575 = vrot.lane.b32.xlu2 %v1381_v28, %s1147_s26 }
  0x7b   : > { %579 = vrot.lane.b32.xlu1 %v1395_v37, %s1147_s26  ;;  %577 = vrot.lane.b32.xlu0 %v1387_v31, %s1147_s26 }
  0x7c   : > { %581 = vrot.lane.b32.xlu2 %v1393_v36, %s1147_s26 }
  0x9e   : > { %v395_v38 = vpop.permute.xlu2 %394 }
  0xa6   : > { %v397_v39 = vpop.permute.xlu2 %396 }
  0xa7   : > { %v403_v49 = vsel %vm402_vm2, %v395_v38, %v397_v39 }
  0xa8   : > { %v415_v54 = vmul.f32 %v411_v46, %v403_v49  ;;  %v449_v46 = vperm.slane %v1422_v61, 3 }
  0xae   : > { %v1413_v43 = vpop.permute.xlu2 %431 }
  0xaf   : > { %v446_v51 = vsel %vm361_vm3, 0.0, %v1413_v43 }
  0xb0   : > { %v451_v56 = vmul.f32 %v447_v48, %v446_v51 }
  0xb5   : > { %v358_v44 = vpop.permute.xlu1 %357  ;;  %v354_v47 = vpop.permute.xlu0 %353 }
  0xb6   : > { %v369_v50 = vsel %vm361_vm3, 0.0, %v354_v47  ;;  %v438_v59 = vpop.permute.xlu2 %437 }
  0xb7   : > { %v374_v53 = vmul.f32 %v370_v42, %v369_v50 }
  0xb9   : > { %v390_v55 = vadd.f32 %v386_v45, %v374_v53  ;;  %v448_v45 = vperm.slane %v1429_v3, 3 }
  0xbb   : > { %v419_v58 = vadd.f32 %v415_v54, %v390_v55 }
  0xbd   : > { %v360_v60 = vpop.permute.xlu1 %359  ;;  %v455_v62 = vadd.f32 %v451_v56, %v419_v58  ;;  %v356_v63 = vpop.permute.xlu0 %355 }
  0xbe   : > { %v364_v10 = vsel %vm361_vm3, %v358_v44, %v360_v60  ;;  %v1438_v14 = vpop.permute.xlu2 %475  ;;  %v362_v21 = vsel %vm361_vm3, %v354_v47, %v356_v63  ;;  %v363_v8 = vsel %vm361_vm3, %v356_v63, %v358_v44  ;;  %v465_v47 = vmul.f32 %v461_v17, %v1359_v18 }
  0xbf   : > { %v1424_v0 = vadd.f32 %v463_v57, %v455_v62  ;;  %v377_v29 = vmul.f32 %v373_v6, %v364_v10  ;;  %v375_v35 = vmul.f32 %v371_v11, %v362_v21  ;;  %v376_v38 = vmul.f32 %v372_v12, %v363_v8 }
  0xc0   : > { %v487_v10 = vperm.slane %v1409_v40, 5  ;;  %v563_v12 = vperm.slane %v1409_v40, 7 }
  0xc1   : > { %v393_v48 = vadd.f32 %v389_v23, %v377_v29  ;;  %v391_v50 = vadd.f32 %v387_v33, %v375_v35  ;;  %v392_v51 = vadd.f32 %v388_v5, %v376_v38  ;;  %v552_v23 = vperm.slane %v1429_v3, 6 }
  0xc2   : > { %v489_v38 = vperm.slane %v1422_v61, 5 }
  0xc5   : > { %v401_v7 = vpop.permute.xlu1 %400  ;;  %v399_v13 = vpop.permute.xlu0 %398 }
  0xc6   : > { %v410_v24 = vsel %vm402_vm2, %v401_v7, 0.0  ;;  %v404_v30 = vsel %vm402_vm2, %v397_v39, %v399_v13  ;;  %v405_v32 = vsel %vm402_vm2, %v399_v13, %v401_v7  ;;  %v464_v39 = vmul.f32 %v460_v27, %v1362_v19  ;;  %v538_v62 = vpop.permute.xlu2 %537 }
  0xc7   : > { %v418_v15 = vmul.f32 %v414_v22, %v410_v24  ;;  %v416_v42 = vmul.f32 %v412_v25, %v404_v30  ;;  %v417_v44 = vmul.f32 %v413_v26, %v405_v32  ;;  %v564_v13 = vperm.slane %v1429_v3, 7 }
  0xc8   : > { %v551_v22 = vperm.slane %v1409_v40, 6  ;;  %v567_v25 = vmul.f32 %v563_v12, %v1381_v28  ;;  %v490_v40 = vperm.slane %v1427_v2, 5 }
  0xc9   : > { %v422_v54 = vadd.f32 %v418_v15, %v393_v48  ;;  %v420_v58 = vadd.f32 %v416_v42, %v391_v50  ;;  %v421_v18 = vadd.f32 %v417_v44, %v392_v51  ;;  %v568_v26 = vmul.f32 %v564_v13, %v1387_v31  ;;  %v906_v50 = vld [vmem:[#allocation7 + $0x38] ss:$0 sm:$0xff] }
  0xca   : > { %v565_v42 = vperm.slane %v1422_v61, 7 }
  0xcc   : > { %v569_v51 = vmul.f32 %v565_v42, %v1395_v37  ;;  %v908_v37 = vld [vmem:[#allocation7 + $0x20] ss:$0 sm:$0xff] }
  0xcd   : > { %v436_v49 = vpop.permute.xlu1 %435  ;;  %v434_v53 = vpop.permute.xlu0 %433 }
  0xce   : > { %v441_v52 = vsel %vm361_vm3, %v436_v49, %v438_v59  ;;  %v439_v56 = vsel %vm361_vm3, %v1413_v43, %v434_v53  ;;  %v440_v57 = vsel %vm361_vm3, %v434_v53, %v436_v49  ;;  %v1470_v17 = vpop.permute.xlu2 %575 }
  0xcf   : > { %v454_v55 = vmul.f32 %v450_v41, %v441_v52  ;;  %v452_v60 = vmul.f32 %v448_v45, %v439_v56  ;;  %v453_v19 = vmul.f32 %v449_v46, %v440_v57  ;;  %v566_v41 = vperm.slane %v1427_v2, 7  ;;  %v317_v57 = vld [vmem:[#allocation8] sm:$0xf] }
  0xd1   : > { %v458_v63 = vadd.f32 %v454_v55, %v422_v54  ;;  %v456_v1 = vadd.f32 %v452_v60, %v420_v58  ;;  %v457_v20 = vadd.f32 %v453_v19, %v421_v18  ;;  %v907_v60 = vld [vmem:[#allocation7 + $0x30] ss:$0 sm:$0xff] }
  0xd3   : > { %v470_v4 = vadd.f32 %v466_v16, %v458_v63  ;;  %v468_v5 = vadd.f32 %v464_v39, %v456_v1  ;;  %v469_v6 = vadd.f32 %v465_v47, %v457_v20  ;;  %v553_v47 = vperm.slane %v1422_v61, 6  ;;  %v909_v20 = vld [vmem:[#allocation7 + $0x28] ss:$0 sm:$0xff] }
  0xd4   : > { %v554_v39 = vperm.slane %v1427_v2, 6  ;;  %v570_v16 = vmul.f32 %v566_v41, %v1393_v36  ;;  %v607_v63 = vperm.slane %v317_v57, 3 }
  0xd5   : > { %v474_v59 = vpop.permute.xlu1 %473  ;;  %v472_v7 = vpop.permute.xlu0 %471 }
  0xd6   : > { %v480_v43 = vsel %vm402_vm2, %v474_v59, %v1438_v14  ;;  %v479_v11 = vsel %vm402_vm2, %v472_v7, %v474_v59  ;;  %v582_v48 = vpop.permute.xlu2 %581 }
  0xd7   : > { %v492_v21 = vmul.f32 %v488_v9, %v480_v43  ;;  %v491_v8 = vmul.f32 %v487_v10, %v479_v11  ;;  %v590_v54 = vsel %vm402_vm2, %v582_v48, 0.0  ;;  %v604_v43 = vperm.slane %v317_v57, 0 }
  0xd8   : > { %v598_v18 = vmul.f32 %v906_v50, %v590_v54 }
  0xd9   : > { %v496_v32 = vadd.f32 %v492_v21, %v468_v5  ;;  %v495_v33 = vadd.f32 %v491_v8, %v1424_v0  ;;  %v605_v21 = vperm.slane %v317_v57, 1 }
  0xdd   : > { %v536_v24 = vpop.permute.xlu1 %535  ;;  %v478_v30 = vpop.permute.xlu0 %477 }
  0xde   : > { %v543_v27 = vsel %vm361_vm3, %v536_v24, %v538_v62  ;;  %v550_v29 = vsel %vm361_vm3, 0.0, %v536_v24  ;;  %v481_v28 = vsel %vm402_vm2, %v1438_v14, %v478_v30  ;;  %v486_v31 = vsel %vm402_vm2, %v478_v30, 0.0 }
  0xdf   : > { %v555_v34 = vmul.f32 %v551_v22, %v550_v29  ;;  %v556_v35 = vmul.f32 %v552_v23, %v543_v27  ;;  %v493_v45 = vmul.f32 %v489_v38, %v481_v28  ;;  %v494_v46 = vmul.f32 %v490_v40, %v486_v31 }
  0xe1   : > { %v559_v3 = vadd.f32 %v555_v34, %v495_v33  ;;  %v560_v15 = vadd.f32 %v556_v35, %v496_v32  ;;  %v497_v55 = vadd.f32 %v493_v45, %v469_v6  ;;  %v498_v61 = vadd.f32 %v494_v46, %v470_v4 }
  0xe2   : > { %v606_v4 = vperm.slane %v317_v57, 2 }
  0xe3   : > { %v571_v0 = vadd.f32 %v567_v25, %v559_v3  ;;  %v572_v44 = vadd.f32 %v568_v26, %v560_v15 }
  0xe5   : > { %v542_v49 = vpop.permute.xlu1 %541  ;;  %v540_v14 = vpop.permute.xlu0 %539 }
  0xe6   : > { %v544_v52 = vsel %vm361_vm3, %v538_v62, %v540_v14  ;;  %v545_v53 = vsel %vm361_vm3, %v540_v14, %v542_v49 }
  0xe7   : > { %v557_v56 = vmul.f32 %v553_v47, %v544_v52  ;;  %v558_v2 = vmul.f32 %v554_v39, %v545_v53 }
  0xe9   : > { %v561_v58 = vadd.f32 %v557_v56, %v497_v55  ;;  %v562_v36 = vadd.f32 %v558_v2, %v498_v61 }
  0xeb   : > { %v574_v19 = vadd.f32 %v570_v16, %v562_v36  ;;  %v573_v1 = vadd.f32 %v569_v51, %v561_v58 }
  0xed   : > { %v580_v62 = vpop.permute.xlu1 %579  ;;  %v602_v5 = vadd.f32 %v598_v18, %v574_v19  ;;  %v578_v59 = vpop.permute.xlu0 %577 }
  0xee   : > { %v585_v6 = vsel %vm402_vm2, %v580_v62, %v582_v48  ;;  %v583_v9 = vsel %vm402_vm2, %v1470_v17, %v578_v59  ;;  %v584_v10 = vsel %vm402_vm2, %v578_v59, %v580_v62 }
  0xef   : > { %v597_v7 = vmul.f32 %v907_v60, %v585_v6  ;;  %v615_v11 = vadd.f32 %v607_v63, %v602_v5  ;;  %v595_v12 = vmul.f32 %v908_v37, %v583_v9  ;;  %v596_v13 = vmul.f32 %v909_v20, %v584_v10 }
  0xf1   : > { %v601_v8 = vadd.f32 %v597_v7, %v573_v1  ;;  %619 = vst [vmem:[%s308_s10 + $0x18] sm:$0xff] %v615_v11  ;;  %v599_v22 = vadd.f32 %v595_v12, %v571_v0  ;;  %v600_v23 = vadd.f32 %v596_v13, %v572_v44 }
  0xf3   : > { %v614_v17 = vadd.f32 %v606_v4, %v601_v8  ;;  %v612_v24 = vadd.f32 %v604_v43, %v599_v22  ;;  %v613_v25 = vadd.f32 %v605_v21, %v600_v23 }
  0xf5   : > { %618 = vst [vmem:[%s308_s10 + $0x10] sm:$0xff] %v614_v17 }
  0xf6   : > { %616 = vst [vmem:[%s308_s10] sm:$0xff] %v612_v24 }
  0xf7   : > { %617 = vst [vmem:[%s308_s10 + $0x8] sm:$0xff] %v613_v25 }
  0xf8   : > { %1057 = shalt.err (!%p1054_p12)
}
  0xf9   : > { %810 = dma.vmem_to_hbm [thread:$0]  (%p1260_p0), %s637_s12, 512, %s639_s25, %s621_s11  }
  0xfa PF: > { %p835_p13 = scmp.ge.s32.totalorder %s1140_s22, 2  ;;  %s650_s2 = sand.u32 1, %s1112_s15  }
  0xfb   : > { %s651_s29 = scalar_lea.sflag [#allocation4], %s650_s2 }
  0xfc   : > { %p827_p2 = pnand %p835_p13, %p1267_p6 }
  0xfe   : > { %p828_p4 = pneg %p827_p2 }
 0x100   : > { %1107 = dma.done.wait (%p828_p4), %s651_s29, 512  }
 0x101   : > { %1109 = vsyncadd (%p828_p4), %s651_s29, 4294966784  ;;  %s24_s22 = sadd.s32 1, %s1140_s22   ;;  %s1568_s18 = sld [smem:[#allocation16_spill]] }
 0x102   : > { %p21_p5 = scmp.ge.s32.totalorder %s24_s22, 6   ;;  %s1569_s19 = sld [smem:[#allocation17_spill]] }
 0x103   : > { %s1570_s20 = sld [smem:[#allocation18_spill]]  ;;  %s1572_s15 = smov %s1116_s16 }
 0x104   : > { %s1571_s21 = sld [smem:[#allocation19_spill]]  ;;  %s1573_s16 = smov %s1120_s17 }
 0x105   : > { %s1574_s17 = smov %s1274_s8  ;;  %23 = sbr.rel (!%p21_p5) target bundleno = 14 (0xe), region = 103 }
 0x10a   :  { %657 = vsyncpa [#allocation3], 1 }
 0x10b   :  { %659 = vsyncpa [#allocation3 + $0x1], 1 }
 0x10c   :  { %660 = vsyncpa [#allocation6], 1 }
 0x10d   :  { %662 = vsyncpa [#allocation6 + $0x1], 1 }
 0x10e   :  { %663 = vsyncpa [#allocation9], 1 }
 0x10f   :  { %664 = vsyncpa [#allocation4], 1 }
 0x110   :  { %666 = vsyncpa [#allocation4 + $0x1], 1 }

</bundles_post_ra>
